<compile_context>
chip_gen: v7x
topology: tpu7x:2x2x1
jax: 0.10.0
libtpu: 0.0.40
codegen_flags: <defaults>
</compile_context>

<pallas_src>
import jax
import jax.numpy as jnp
from jax import lax
from jax.experimental import pallas as pl
from jax.experimental.pallas import tpu as pltpu


def _elu1(x):
    # F.elu(x) + 1.0  (exp clamped so the untaken branch never overflows)
    return jnp.where(x > 0, x, jnp.exp(jnp.minimum(x, 0.0)) - 1.0) + 1.0


def make_cm_attention_kernel(dim_key, update, matmul_dtype):
    DK = dim_key
    scale = 1.0 / (DK ** 0.5)
    mdt = matmul_dtype

    def kernel(q_ref, k_ref, v_ref, betas_ref, o_ref, mem_ref, z_ref):
        seg = pl.program_id(2)

        @pl.when(seg == 0)
        def _():
            # fresh compressive-memory state for a new (batch, head-group)
            mem_ref[...] = jnp.zeros_like(mem_ref)
            z_ref[...] = jnp.full_like(z_ref, 1.0 / DK)

        q = q_ref[0, 0]      # (hpg, L, DK)  streamed dtype (f32 or bf16)
        k = k_ref[0, 0]      # (hpg, L, DK)
        v = v_ref[0, 0]      # (hpg, L, DV)

        # elementwise math in f32 (works on v5e VPU/EUP too)
        sigma_q = _elu1(q.astype(jnp.float32))
        sigma_k = _elu1(k.astype(jnp.float32))

        mem = mem_ref[...]   # (hpg, DK, DV) f32, state BEFORE this segment
        z = z_ref[...]       # (hpg, 1, DK)  f32

        # --- intra-segment softmax attention (explicit softmax, EUP recip) ---
        scores = jnp.einsum('hld,hmd->hlm', q, k,
                            preferred_element_type=jnp.float32) * scale
        m = jnp.max(scores, axis=-1, keepdims=True)
        e = jnp.exp(scores - m)
        p = e * pl.reciprocal(jnp.sum(e, axis=-1, keepdims=True), approx=True)
        att_dot = jnp.einsum('hlm,hmv->hlv', p.astype(mdt), v,
                             preferred_element_type=jnp.float32)

        # --- compressive-memory read (old state) -----------------------------
        denom = jnp.sum(sigma_q * z, axis=-1, keepdims=True)           # (hpg,L,1)
        att_mem = jnp.einsum('hld,hdv->hlv', sigma_q.astype(mdt), mem.astype(mdt),
                             preferred_element_type=jnp.float32)
        att_mem = att_mem * pl.reciprocal(denom, approx=True)

        # --- memory update ----------------------------------------------------
        if update == "linear":
            mem_upd = jnp.einsum('hld,hlv->hdv', sigma_k.astype(mdt), v,
                                 preferred_element_type=jnp.float32)
        else:  # "delta"
            denom_k = jnp.sum(sigma_k * z, axis=-1, keepdims=True)     # (hpg,L,1)
            retr = jnp.einsum('hld,hdv->hlv', sigma_k.astype(mdt), mem.astype(mdt),
                              preferred_element_type=jnp.float32)
            # exact divide here: this feeds the recurrent state, so approx
            # reciprocal error would compound across segments.
            retr = retr / denom_k
            mem_upd = jnp.einsum('hld,hlv->hdv', sigma_k.astype(mdt),
                                 (v.astype(jnp.float32) - retr).astype(mdt),
                                 preferred_element_type=jnp.float32)
        mem_ref[...] = mem + mem_upd
        z_ref[...] = z + jnp.sum(sigma_k, axis=1, keepdims=True)

        # --- gate (sigmoid(betas) precomputed) --------------------------------
        g = betas_ref[...]                        # (hpg, 1, DV)
        att = g * att_mem + (1.0 - g) * att_dot   # (hpg, L, DV)
        o_ref[0, 0] = att.astype(o_ref.dtype)

    return kernel


def infini_transformer_forward(x, params, *, num_heads, segment_len, dim_key,
                               dim_value, update="linear",
                               matmul_dtype=jnp.float32, heads_per_block=None):
    B, S, D = x.shape
    H, L, DK, DV = num_heads, segment_len, dim_key, dim_value
    assert S % L == 0
    n_seg = S // L
    hpg = H if heads_per_block is None else heads_per_block
    assert H % hpg == 0
    n_hg = H // hpg
    mdt = matmul_dtype
    itemsize = jnp.dtype(mdt).itemsize

    def mm(a, b):
        # MXU-friendly GEMM with f32 accumulation (bf16 operands on v6e/v7x)
        return jnp.dot(a.astype(mdt), b.astype(mdt),
                       preferred_element_type=jnp.float32)

    # Q/K/V projected once by XLA.  The flat reshape reproduces the PyTorch
    # `.view(B, H, S, DK)` head split exactly; the transpose lays segments out
    # so each (b, seg, head-group) grid block is one contiguous DMA.
    def split_heads(proj, dh):
        return (proj.reshape(B, H, n_seg, L, dh)
                    .transpose(0, 2, 1, 3, 4)
                    .astype(mdt))                      # (B, n_seg, H, L, dh)

    qf = split_heads(x @ params["wq"], DK)
    kf = split_heads(x @ params["wk"], DK)
    vf = split_heads(x @ params["wv"], DV)
    betas_sig = jax.nn.sigmoid(params["betas"]).reshape(H, 1, DV).astype(jnp.float32)

    kernel = make_cm_attention_kernel(DK, update, mdt)

    in_specs = [
        pl.BlockSpec((1, 1, hpg, L, DK), lambda b, g, s: (b, s, g, 0, 0)),   # q
        pl.BlockSpec((1, 1, hpg, L, DK), lambda b, g, s: (b, s, g, 0, 0)),   # k
        pl.BlockSpec((1, 1, hpg, L, DV), lambda b, g, s: (b, s, g, 0, 0)),   # v
        pl.BlockSpec((hpg, 1, DV), lambda b, g, s: (g, 0, 0)),               # gate
    ]
    out_specs = pl.BlockSpec((1, 1, hpg, L, DV), lambda b, g, s: (b, s, g, 0, 0))

    # VMEM budget: double-buffered streamed blocks + temps + carried state,
    # with headroom, capped at 48 MiB so v7x (64 MiB/TC) keeps compiler slack.
    block_bytes = hpg * L * (2 * DK + 2 * DV) * itemsize          # q,k,v,out blocks
    temp_bytes = 4 * hpg * (L * L + 8 * L * max(DK, DV))          # scores + f32 temps
    state_bytes = 4 * hpg * (DK * DV + DK)
    est = 2 * block_bytes + temp_bytes + state_bytes + 2 * hpg * DV * 4
    vmem_limit = int(min(max(2 * est, 8 * 1024 * 1024), 48 * 1024 * 1024))

    # advisory cost estimate (rough; not for roofline reasoning)
    flops = 2 * B * n_seg * H * L * (
        L * DK + L * DV + 2 * DK * DV + (DK * DV if update == "delta" else 0))
    transcendentals = B * n_seg * H * L * (L + 2 * DK)
    bytes_accessed = (B * n_seg * H * L * (2 * DK + DV) * itemsize   # q,k,v in
                      + B * n_seg * H * L * DV * itemsize            # att out
                      + H * DV * 4)

    att = pl.pallas_call(
        kernel,
        out_shape=jax.ShapeDtypeStruct((B, n_seg, H, L, DV), mdt),
        grid_spec=pltpu.PrefetchScalarGridSpec(
            num_scalar_prefetch=0,
            grid=(B, n_hg, n_seg),
            in_specs=in_specs,
            out_specs=out_specs,
            scratch_shapes=[
                pltpu.VMEM((hpg, DK, DV), jnp.float32),   # compressive memory
                pltpu.VMEM((hpg, 1, DK), jnp.float32),    # normalizer z
            ],
        ),
        compiler_params=pltpu.CompilerParams(
            dimension_semantics=("parallel", "parallel", "arbitrary"),
            vmem_limit_bytes=vmem_limit),
        cost_estimate=pl.CostEstimate(flops=int(flops),
                                      transcendentals=int(transcendentals),
                                      bytes_accessed=int(bytes_accessed)),
    )(qf, kf, vf, betas_sig)

    # --- epilogue in XLA ------------------------------------------------------
    # Per-segment flat head-merge (PyTorch `.view(B, L, H*DV)` semantics, done
    # once at full size instead of a scrambled VMEM relayout every segment).
    att_flat = att.reshape(B, n_seg, L, H * DV).reshape(B, S, H * DV)
    attn_out = mm(att_flat, params["wout"])
    # MLP (dropout p = 0.0 -> identity)
    h1 = jnp.maximum(mm(attn_out, params["w1"]) + params["b1"], 0.0)
    y = mm(h1, params["w2"]) + params["b2"]
    # residual + LayerNorm (eps = 1e-5, biased variance)
    r = y + x
    mean = jnp.mean(r, axis=-1, keepdims=True)
    var = jnp.mean((r - mean) ** 2, axis=-1, keepdims=True)
    return (r - mean) * lax.rsqrt(var + 1e-5) * params["ln_gamma"] + params["ln_beta"]


def reference_forward(x, params, *, num_heads, segment_len,
                      dim_key, dim_value, update="linear"):
    """Pure-JAX transcription of the PyTorch forward (for verification)."""
    B, S, D = x.shape
    H, L, DK, DV = num_heads, segment_len, dim_key, dim_value
    n_seg = S // L
    elu1 = lambda t: jnp.where(t > 0, t, jnp.exp(t) - 1.0) + 1.0

    kf = (x @ params["wk"]).reshape(B, H, S, DK)
    vf = (x @ params["wv"]).reshape(B, H, S, DV)
    qf = (x @ params["wq"]).reshape(B, H, S, DK)
    betas = params["betas"].reshape(1, H, 1, DV)

    mem = jnp.zeros((1, H, DK, DV), jnp.float32)
    z = jnp.ones((B, H, DK, 1), jnp.float32) / DK
    outs = []
    for ix in range(n_seg):
        lo, hi = ix * L, (ix + 1) * L
        k, v, q = kf[:, :, lo:hi], vf[:, :, lo:hi], qf[:, :, lo:hi]
        sq, sk = elu1(q), elu1(k)
        scores = jnp.einsum("bhld,bhmd->bhlm", q, k) / (DK ** 0.5)
        att_dot = jax.nn.softmax(scores, axis=-1) @ v
        att_mem = (sq @ mem) / (sq @ z)
        if update == "linear":
            mem = mem + jnp.einsum("bhld,bhlv->bhdv", sk, v)
        else:
            mem = mem + jnp.einsum("bhld,bhlv->bhdv", sk, v - (sk @ mem) / (sk @ z))
        z = z + jnp.swapaxes(jnp.sum(sk, axis=-2, keepdims=True), -1, -2)
        bs = jax.nn.sigmoid(betas)
        att = bs * att_mem + (1.0 - bs) * att_dot
        att = att.reshape(B, L, H * DV)
        outs.append(att @ params["wout"])
    attn_out = jnp.concatenate(outs, axis=1)

    h1 = jnp.maximum(attn_out @ params["w1"] + params["b1"], 0.0)
    y = h1 @ params["w2"] + params["b2"]
    r = y + x
    mean = r.mean(-1, keepdims=True)
    var = ((r - mean) ** 2).mean(-1, keepdims=True)
    return (r - mean) / jnp.sqrt(var + 1e-5) * params["ln_gamma"] + params["ln_beta"]


if __name__ == "__main__":
    # small config consistent with the module
    B, S, D = 2, 32, 64
    dim_hidden = 128
    num_heads, dim_key, dim_value = 2, 32, 32
    segment_len = 16

    key = jax.random.PRNGKey(0)
    ks = jax.random.split(key, 12)
    sc = lambda fan_in: 1.0 / (fan_in ** 0.5)
    params = {
        "wq": jax.random.normal(ks[0], (D, num_heads * dim_key), jnp.float32) * sc(D),
        "wk": jax.random.normal(ks[1], (D, num_heads * dim_key), jnp.float32) * sc(D),
        "wv": jax.random.normal(ks[2], (D, num_heads * dim_value), jnp.float32) * sc(D),
        "betas": jax.random.normal(ks[3], (num_heads, dim_value), jnp.float32),
        "wout": jax.random.normal(ks[4], (num_heads * dim_value, D), jnp.float32) * sc(num_heads * dim_value),
        "w1": jax.random.normal(ks[5], (D, dim_hidden), jnp.float32) * sc(D),
        "b1": jax.random.normal(ks[6], (1, dim_hidden), jnp.float32) * 0.01,
        "w2": jax.random.normal(ks[7], (dim_hidden, D), jnp.float32) * sc(dim_hidden),
        "b2": jax.random.normal(ks[8], (1, D), jnp.float32) * 0.01,
        "ln_gamma": 1.0 + 0.05 * jax.random.normal(ks[10], (1, D), jnp.float32),
        "ln_beta": 0.05 * jax.random.normal(ks[11], (1, D), jnp.float32),
    }
    x = jax.random.normal(ks[9], (B, S, D), jnp.float32)

    # f32 streaming path, both memory-update rules; the second test also
    # exercises the parallel head-group grid axis (heads_per_block=1).
    test_cfgs = [
        dict(update="linear", heads_per_block=None),
        dict(update="delta", heads_per_block=1),
    ]
    for tc in test_cfgs:
        cfg = dict(num_heads=num_heads, segment_len=segment_len,
                   dim_key=dim_key, dim_value=dim_value, update=tc["update"])
        out = jax.block_until_ready(
            infini_transformer_forward(x, params,
                                       heads_per_block=tc["heads_per_block"], **cfg))
        ref = jax.block_until_ready(reference_forward(x, params, **cfg))
        assert out.shape == (B, S, D)
        err = float(jnp.max(jnp.abs(out - ref)))
        assert bool(jnp.allclose(out, ref, atol=5e-3, rtol=5e-3)), (
            "%s mismatch: max abs diff %e" % (tc["update"], err))

    # bf16 streaming / MXU-operand path (v6e/v7x recommendation): f32
    # accumulation and f32 state.  Validate at realistic L before making it
    # the default (memory accumulates over many segments).
    cfg = dict(num_heads=num_heads, segment_len=segment_len,
               dim_key=dim_key, dim_value=dim_value, update="linear")
    out_bf16 = jax.block_until_ready(
        infini_transformer_forward(x, params, matmul_dtype=jnp.bfloat16,
                                   heads_per_block=1, **cfg))
    ref = reference_forward(x, params, **cfg)
    assert bool(jnp.isfinite(out_bf16).all())
    assert float(jnp.max(jnp.abs(out_bf16 - ref))) < 0.5

    print("KERNEL_OK")
</pallas_src>

<mosaic_0001>
module attributes {stable_mosaic.version = 11 : i64} {
  func.func @kernel(%arg0: i32, %arg1: i32, %arg2: i32, %arg3: memref<1x1x2x16x32xf32, #tpu.memory_space<vmem>>, %arg4: memref<1x1x2x16x32xf32, #tpu.memory_space<vmem>>, %arg5: memref<1x1x2x16x32xf32, #tpu.memory_space<vmem>>, %arg6: memref<2x1x32xf32, #tpu.memory_space<vmem>>, %arg7: memref<1x1x2x16x32xf32, #tpu.memory_space<vmem>>, %arg8: memref<2x32x32xf32, #tpu.memory_space<vmem>>, %arg9: memref<2x1x32xf32, #tpu.memory_space<vmem>>) attributes {dimension_semantics = [#tpu.dimension_semantics<parallel>, #tpu.dimension_semantics<parallel>, #tpu.dimension_semantics<arbitrary>], iteration_bounds = array<i64: 2, 1, 2>, scalar_prefetch = 0 : i64, scratch_operands = 2 : i64, tpu.core_type = #tpu.core_type<tc>, window_params = [{transform_indices = @transform_0, window_bounds = array<i64: 1, 1, 2, 16, 32>}, {transform_indices = @transform_1, window_bounds = array<i64: 1, 1, 2, 16, 32>}, {transform_indices = @transform_2, window_bounds = array<i64: 1, 1, 2, 16, 32>}, {transform_indices = @transform_3, window_bounds = array<i64: 2, 1, 32>}, {transform_indices = @transform_4, window_bounds = array<i64: 1, 1, 2, 16, 32>}]} {
    %c0_i32 = arith.constant 0 : i32
    %0 = arith.cmpi eq, %arg2, %c0_i32 : i32
    %1 = arith.extui %0 : i1 to i32
    %c0_i32_0 = arith.constant 0 : i32
    %2 = arith.cmpi ne, %1, %c0_i32_0 : i32
    scf.if %2 {
      %cst_52 = arith.constant 0.000000e+00 : f32
      %71 = vector.broadcast %cst_52 : f32 to vector<2x32x32xf32>
      %c0_53 = arith.constant 0 : index
      %c0_54 = arith.constant 0 : index
      %c0_55 = arith.constant 0 : index
      %72 = vector.load %arg8[%c0_53, %c0_54, %c0_55] : memref<2x32x32xf32, #tpu.memory_space<vmem>>, vector<2x32x32xf32>
      tpu.vector_store %arg8[%c0_53, %c0_54, %c0_55], %71 {strides = array<i32>} : memref<2x32x32xf32, #tpu.memory_space<vmem>>, vector<2x32x32xf32>,
      %cst_56 = arith.constant 3.125000e-02 : f32
      %73 = vector.broadcast %cst_56 : f32 to vector<2x1x32xf32>
      %c0_57 = arith.constant 0 : index
      %c0_58 = arith.constant 0 : index
      %c0_59 = arith.constant 0 : index
      %74 = vector.load %arg9[%c0_57, %c0_58, %c0_59] : memref<2x1x32xf32, #tpu.memory_space<vmem>>, vector<2x1x32xf32>
      tpu.vector_store %arg9[%c0_57, %c0_58, %c0_59], %73 {strides = array<i32>} : memref<2x1x32xf32, #tpu.memory_space<vmem>>, vector<2x1x32xf32>,
    } else {
    }
    %c0 = arith.constant 0 : index
    %c0_1 = arith.constant 0 : index
    %c0_2 = arith.constant 0 : index
    %c0_3 = arith.constant 0 : index
    %c0_4 = arith.constant 0 : index
    %3 = vector.load %arg3[%c0, %c0_1, %c0_2, %c0_3, %c0_4] : memref<1x1x2x16x32xf32, #tpu.memory_space<vmem>>, vector<1x1x2x16x32xf32>
    %4 = vector.shape_cast %3 : vector<1x1x2x16x32xf32> to vector<2x16x32xf32>
    %c0_5 = arith.constant 0 : index
    %c0_6 = arith.constant 0 : index
    %c0_7 = arith.constant 0 : index
    %c0_8 = arith.constant 0 : index
    %c0_9 = arith.constant 0 : index
    %5 = vector.load %arg4[%c0_5, %c0_6, %c0_7, %c0_8, %c0_9] : memref<1x1x2x16x32xf32, #tpu.memory_space<vmem>>, vector<1x1x2x16x32xf32>
    %6 = vector.shape_cast %5 : vector<1x1x2x16x32xf32> to vector<2x16x32xf32>
    %c0_10 = arith.constant 0 : index
    %c0_11 = arith.constant 0 : index
    %c0_12 = arith.constant 0 : index
    %c0_13 = arith.constant 0 : index
    %c0_14 = arith.constant 0 : index
    %7 = vector.load %arg5[%c0_10, %c0_11, %c0_12, %c0_13, %c0_14] : memref<1x1x2x16x32xf32, #tpu.memory_space<vmem>>, vector<1x1x2x16x32xf32>
    %8 = vector.shape_cast %7 : vector<1x1x2x16x32xf32> to vector<2x16x32xf32>
    %cst = arith.constant 0.000000e+00 : f32
    %9 = vector.broadcast %cst : f32 to vector<2x16x32xf32>
    %10 = arith.cmpf ogt, %4, %9 : vector<2x16x32xf32>
    %cst_15 = arith.constant 0.000000e+00 : f32
    %11 = vector.broadcast %cst_15 : f32 to vector<2x16x32xf32>
    %12 = arith.minimumf %4, %11 : vector<2x16x32xf32>
    %13 = math.exp %12 : vector<2x16x32xf32>
    %cst_16 = arith.constant 1.000000e+00 : f32
    %14 = vector.broadcast %cst_16 : f32 to vector<2x16x32xf32>
    %15 = arith.subf %13, %14 : vector<2x16x32xf32>
    %16 = arith.select %10, %4, %15 : vector<2x16x32xi1>, vector<2x16x32xf32>
    %cst_17 = arith.constant 1.000000e+00 : f32
    %17 = vector.broadcast %cst_17 : f32 to vector<2x16x32xf32>
    %18 = arith.addf %16, %17 : vector<2x16x32xf32>
    %cst_18 = arith.constant 0.000000e+00 : f32
    %19 = vector.broadcast %cst_18 : f32 to vector<2x16x32xf32>
    %20 = arith.cmpf ogt, %6, %19 : vector<2x16x32xf32>
    %cst_19 = arith.constant 0.000000e+00 : f32
    %21 = vector.broadcast %cst_19 : f32 to vector<2x16x32xf32>
    %22 = arith.minimumf %6, %21 : vector<2x16x32xf32>
    %23 = math.exp %22 : vector<2x16x32xf32>
    %cst_20 = arith.constant 1.000000e+00 : f32
    %24 = vector.broadcast %cst_20 : f32 to vector<2x16x32xf32>
    %25 = arith.subf %23, %24 : vector<2x16x32xf32>
    %26 = arith.select %20, %6, %25 : vector<2x16x32xi1>, vector<2x16x32xf32>
    %cst_21 = arith.constant 1.000000e+00 : f32
    %27 = vector.broadcast %cst_21 : f32 to vector<2x16x32xf32>
    %28 = arith.addf %26, %27 : vector<2x16x32xf32>
    %c0_22 = arith.constant 0 : index
    %c0_23 = arith.constant 0 : index
    %c0_24 = arith.constant 0 : index
    %29 = vector.load %arg8[%c0_22, %c0_23, %c0_24] : memref<2x32x32xf32, #tpu.memory_space<vmem>>, vector<2x32x32xf32>
    %c0_25 = arith.constant 0 : index
    %c0_26 = arith.constant 0 : index
    %c0_27 = arith.constant 0 : index
    %30 = vector.load %arg9[%c0_25, %c0_26, %c0_27] : memref<2x1x32xf32, #tpu.memory_space<vmem>>, vector<2x1x32xf32>
    "tpu.trace_start"() <{level = 10 : i32, message = "hld,hmd->hlm"}> : () -> ()
    %cst_28 = arith.constant dense<0.000000e+00> : vector<2x16x16xf32>
    %31 = tpu.matmul %4, %6, %cst_28 {dimension_numbers = #tpu.dot_dimension_numbers<[2], [2], [1], [1], [0, 0, 0, 1, 1, 1], [0], [0]>} : vector<2x16x32xf32>, vector<2x16x32xf32>, vector<2x16x16xf32> -> vector<2x16x16xf32>
    "tpu.trace_stop"() : () -> ()
    %cst_29 = arith.constant 0.176776692 : f32
    %32 = vector.broadcast %cst_29 : f32 to vector<2x16x16xf32>
    %33 = arith.mulf %31, %32 : vector<2x16x16xf32>
    %cst_30 = arith.constant dense<0xFF800000> : vector<2x16xf32>
    %34 = vector.multi_reduction <maximumf>, %33, %cst_30 [2] : vector<2x16x16xf32> to vector<2x16xf32>
    %35 = vector.shape_cast %34 : vector<2x16xf32> to vector<2x16x1xf32>
    %36 = vector.broadcast %35 : vector<2x16x1xf32> to vector<2x16x16xf32>
    %37 = arith.subf %33, %36 : vector<2x16x16xf32>
    %38 = math.exp %37 : vector<2x16x16xf32>
    %cst_31 = arith.constant dense<0.000000e+00> : vector<2x16xf32>
    %39 = vector.multi_reduction <add>, %38, %cst_31 [2] : vector<2x16x16xf32> to vector<2x16xf32>
    %40 = vector.shape_cast %39 : vector<2x16xf32> to vector<2x16x1xf32>
    %41 = tpu.reciprocal %40 {approx = true} : vector<2x16x1xf32> -> vector<2x16x1xf32>
    %42 = vector.broadcast %41 : vector<2x16x1xf32> to vector<2x16x16xf32>
    %43 = arith.mulf %38, %42 : vector<2x16x16xf32>
    "tpu.trace_start"() <{level = 10 : i32, message = "hlm,hmv->hlv"}> : () -> ()
    %cst_32 = arith.constant dense<0.000000e+00> : vector<2x16x32xf32>
    %44 = tpu.matmul %43, %8, %cst_32 {dimension_numbers = #tpu.dot_dimension_numbers<[2], [1], [1], [2], [0, 0, 0, 1, 1, 2], [0], [0]>} : vector<2x16x16xf32>, vector<2x16x32xf32>, vector<2x16x32xf32> -> vector<2x16x32xf32>
    "tpu.trace_stop"() : () -> ()
    %45 = vector.broadcast %30 : vector<2x1x32xf32> to vector<2x16x32xf32>
    %46 = arith.mulf %18, %45 : vector<2x16x32xf32>
    %cst_33 = arith.constant dense<0.000000e+00> : vector<2x16xf32>
    %47 = vector.multi_reduction <add>, %46, %cst_33 [2] : vector<2x16x32xf32> to vector<2x16xf32>
    %48 = vector.shape_cast %47 : vector<2x16xf32> to vector<2x16x1xf32>
    "tpu.trace_start"() <{level = 10 : i32, message = "hld,hdv->hlv"}> : () -> ()
    %cst_34 = arith.constant dense<0.000000e+00> : vector<2x16x32xf32>
    %49 = tpu.matmul %18, %29, %cst_34 {dimension_numbers = #tpu.dot_dimension_numbers<[2], [1], [1], [2], [0, 0, 0, 1, 1, 2], [0], [0]>} : vector<2x16x32xf32>, vector<2x32x32xf32>, vector<2x16x32xf32> -> vector<2x16x32xf32>
    "tpu.trace_stop"() : () -> ()
    %50 = tpu.reciprocal %48 {approx = true} : vector<2x16x1xf32> -> vector<2x16x1xf32>
    %51 = vector.broadcast %50 : vector<2x16x1xf32> to vector<2x16x32xf32>
    %52 = arith.mulf %49, %51 : vector<2x16x32xf32>
    "tpu.trace_start"() <{level = 10 : i32, message = "hld,hlv->hdv"}> : () -> ()
    %cst_35 = arith.constant dense<0.000000e+00> : vector<2x32x32xf32>
    %53 = tpu.matmul %28, %8, %cst_35 {dimension_numbers = #tpu.dot_dimension_numbers<[1], [1], [2], [2], [0, 0, 0, 2, 1, 2], [0], [0]>} : vector<2x16x32xf32>, vector<2x16x32xf32>, vector<2x32x32xf32> -> vector<2x32x32xf32>
    "tpu.trace_stop"() : () -> ()
    %54 = arith.addf %29, %53 : vector<2x32x32xf32>
    %c0_36 = arith.constant 0 : index
    %c0_37 = arith.constant 0 : index
    %c0_38 = arith.constant 0 : index
    %55 = vector.load %arg8[%c0_36, %c0_37, %c0_38] : memref<2x32x32xf32, #tpu.memory_space<vmem>>, vector<2x32x32xf32>
    tpu.vector_store %arg8[%c0_36, %c0_37, %c0_38], %54 {strides = array<i32>} : memref<2x32x32xf32, #tpu.memory_space<vmem>>, vector<2x32x32xf32>,
    %cst_39 = arith.constant dense<0.000000e+00> : vector<2x32xf32>
    %56 = vector.multi_reduction <add>, %28, %cst_39 [1] : vector<2x16x32xf32> to vector<2x32xf32>
    %57 = vector.shape_cast %56 : vector<2x32xf32> to vector<2x1x32xf32>
    %58 = arith.addf %30, %57 : vector<2x1x32xf32>
    %c0_40 = arith.constant 0 : index
    %c0_41 = arith.constant 0 : index
    %c0_42 = arith.constant 0 : index
    %59 = vector.load %arg9[%c0_40, %c0_41, %c0_42] : memref<2x1x32xf32, #tpu.memory_space<vmem>>, vector<2x1x32xf32>
    tpu.vector_store %arg9[%c0_40, %c0_41, %c0_42], %58 {strides = array<i32>} : memref<2x1x32xf32, #tpu.memory_space<vmem>>, vector<2x1x32xf32>,
    %c0_43 = arith.constant 0 : index
    %c0_44 = arith.constant 0 : index
    %c0_45 = arith.constant 0 : index
    %60 = vector.load %arg6[%c0_43, %c0_44, %c0_45] : memref<2x1x32xf32, #tpu.memory_space<vmem>>, vector<2x1x32xf32>
    %61 = vector.broadcast %60 : vector<2x1x32xf32> to vector<2x16x32xf32>
    %62 = arith.mulf %61, %52 : vector<2x16x32xf32>
    %cst_46 = arith.constant 1.000000e+00 : f32
    %63 = vector.broadcast %cst_46 : f32 to vector<2x1x32xf32>
    %64 = arith.subf %63, %60 : vector<2x1x32xf32>
    %65 = vector.broadcast %64 : vector<2x1x32xf32> to vector<2x16x32xf32>
    %66 = arith.mulf %65, %44 : vector<2x16x32xf32>
    %67 = arith.addf %62, %66 : vector<2x16x32xf32>
    %c0_47 = arith.constant 0 : index
    %c0_48 = arith.constant 0 : index
    %c0_49 = arith.constant 0 : index
    %c0_50 = arith.constant 0 : index
    %c0_51 = arith.constant 0 : index
    %68 = vector.load %arg7[%c0_47, %c0_48, %c0_49, %c0_50, %c0_51] : memref<1x1x2x16x32xf32, #tpu.memory_space<vmem>>, vector<1x1x2x16x32xf32>
    %69 = vector.shape_cast %68 : vector<1x1x2x16x32xf32> to vector<2x16x32xf32>
    %70 = vector.shape_cast %67 : vector<2x16x32xf32> to vector<1x1x2x16x32xf32>
    tpu.vector_store %arg7[%c0_47, %c0_48, %c0_49, %c0_50, %c0_51], %70 {strides = array<i32>} : memref<1x1x2x16x32xf32, #tpu.memory_space<vmem>>, vector<1x1x2x16x32xf32>,
    return
  }
  func.func @transform_0(%arg0: i32, %arg1: i32, %arg2: i32) -> (i32, i32, i32, i32, i32) {
    %c0_i32 = arith.constant 0 : i32
    %c0_i32_0 = arith.constant 0 : i32
    %c0_i32_1 = arith.constant 0 : i32
    return %arg0, %arg2, %arg1, %c0_i32, %c0_i32_0 : i32, i32, i32, i32, i32
  }
  func.func @transform_1(%arg0: i32, %arg1: i32, %arg2: i32) -> (i32, i32, i32, i32, i32) {
    %c0_i32 = arith.constant 0 : i32
    %c0_i32_0 = arith.constant 0 : i32
    %c0_i32_1 = arith.constant 0 : i32
    return %arg0, %arg2, %arg1, %c0_i32, %c0_i32_0 : i32, i32, i32, i32, i32
  }
  func.func @transform_2(%arg0: i32, %arg1: i32, %arg2: i32) -> (i32, i32, i32, i32, i32) {
    %c0_i32 = arith.constant 0 : i32
    %c0_i32_0 = arith.constant 0 : i32
    %c0_i32_1 = arith.constant 0 : i32
    return %arg0, %arg2, %arg1, %c0_i32, %c0_i32_0 : i32, i32, i32, i32, i32
  }
  func.func @transform_3(%arg0: i32, %arg1: i32, %arg2: i32) -> (i32, i32, i32) {
    %c0_i32 = arith.constant 0 : i32
    %c0_i32_0 = arith.constant 0 : i32
    %c0_i32_1 = arith.constant 0 : i32
    return %arg1, %c0_i32, %c0_i32_0 : i32, i32, i32
  }
  func.func @transform_4(%arg0: i32, %arg1: i32, %arg2: i32) -> (i32, i32, i32, i32, i32) {
    %c0_i32 = arith.constant 0 : i32
    %c0_i32_0 = arith.constant 0 : i32
    %c0_i32_1 = arith.constant 0 : i32
    return %arg0, %arg2, %arg1, %c0_i32, %c0_i32_0 : i32, i32, i32, i32, i32
  }
}

</mosaic_0001>

<bundles_post_ra>
// kernel: tpu_custom_call.1
= control target key start
LH: loop header
LB: loop body
LE: loop exit
PB: predicated region body
PF: predicated region fallthrough
CT: control target
= control target key end

     0   :  { %s2643_s0 = inlined_call_operand.hbm [shape: f32[2,2,2,16,32], index: 0, kind: input, shape index: {}]   ;;  %s2644_s1 = inlined_call_operand.hbm [shape: f32[2,2,2,16,32], index: 1, kind: input, shape index: {}]   ;;  %s2645_s2 = inlined_call_operand.hbm [shape: f32[2,2,2,16,32], index: 2, kind: input, shape index: {}]   ;;  %s2646_s3 = inlined_call_operand.vmem [shape: f32[2,1,32], index: 3, kind: input, shape index: {}]   ;;  %s2647_s4 = inlined_call_operand.hbm [shape: f32[2,2,2,16,32], index: 4, kind: output, shape index: {}]  }
   0x1   :  { %2659 = sst [smem:[#allocation19_spill]] %s2643_s0 }
   0x2   :  { %2660 = sst [smem:[#allocation20_spill]] %s2644_s1 }
   0x3   :  { %9 = vsyncpa [#allocation5], 0 }
   0x4   :  { %11 = vsyncpa [#allocation5 + $0x1], 0 }
   0x5   :  { %12 = vsyncpa [#allocation8], 0 }
   0x6   :  { %14 = vsyncpa [#allocation8 + $0x1], 0 }
   0x7   :  { %15 = vsyncpa [#allocation6], 0 }
   0x8   :  { %17 = vsyncpa [#allocation6 + $0x1], 0  ;;  %s2145_s15 = smov 0   ;;  %s2147_s16 = smov 0  }
   0x9   :  { %s2149_s17 = smov 0   ;;  %s2151_s18 = smov 0  }
   0xa   :  { %s2153_s19 = smov 0   ;;  %s2155_s20 = smov 0  }
   0xb   :  { %s2157_s21 = smov 0   ;;  %s2159_s22 = smov 0  }
   0xc LB: > { %2661 = sst [smem:[#allocation14_spill]] %s2100_s20  ;;  %s2186_s23 = sadd.s32 4294967295, %s2108_s22   ;;  %s2108_s22 = sphi %s2159_s22, %s23_s22   ;;  %s2104_s21 = sphi %s2157_s21, %s2687_s21   ;;  %s2100_s20 = sphi %s2155_s20, %s2686_s20   ;;  %s2096_s19 = sphi %s2153_s19, %s2685_s19   ;;  %s2092_s18 = sphi %s2151_s18, %s2684_s18   ;;  %s2088_s17 = sphi %s2149_s17, %s2690_s17   ;;  %s2084_s16 = sphi %s2147_s16, %s2689_s16   ;;  %s2080_s15 = sphi %s2145_s15, %s2688_s15  }
   0xd   : > { %2662 = sst [smem:[#allocation15_spill]] %s2104_s21  ;;  %s1567_s24 = sadd.s32 4294967294, %s2108_s22  }
   0xe   : > { %s35_s25 = sadd.s32 1, %s2100_s20  ;;  %s42_s26 = sadd.s32 1, %s2104_s21 }
   0xf   : > { %p36_p0 = scmp.ge.s32.totalorder %s35_s25, 2  ;;  %s53_s27 = sadd.s32 1, %s2088_s17 }
  0x10   : > { %p60_p1 = scmp.ne.s32.totalorder %s2088_s17, %s2084_s16  ;;  %p61_p2 = scmp.eq.s32.totalorder %s2108_s22, 0 }
  0x11   : > { %s2692_s25 = smov (%p36_p0, %s35_s25), 0  ;;  %s2694_s26 = smov (!%p36_p0, %s42_s26), %s2104_s21 }
  0x12   : > { %2663 = sst [smem:[#allocation16_spill]] %s2692_s25  ;;  %s47_s28 = ssub.s32 %s2100_s20, %s2692_s25 }
  0x13   : > { %p2200_p3 = por %p61_p2, %p60_p1  ;;  %p44_p4 = scmp.ge.s32.totalorder %s2694_s26, 2 }
  0x14   : > { %p66_p5 = scmp.ne.s32.totalorder %s2084_s16, %s2080_s15  ;;  %p67_p6 = scmp.eq.s32.totalorder %s2186_s23, 0 }
  0x15   : > { %p180_p7 = scmp.eq.s32.totalorder %s2186_s23, 3  ;;  %s2696_s26 = smov (%p44_p4, %s2694_s26), 0 }
  0x16   : > { %2665 = sst [smem:[#allocation17_spill]] %s2696_s26  ;;  %p2210_p8 = por %p67_p6, %p66_p5 }
  0x17   : > { %p2214_p9 = por %p180_p7, %p60_p1  ;;  %s46_s6 = ssub.s32 %s2104_s21, %s2696_s26 }
  0x18   : > { %s2666_s30 = scalar_select %p2210_p8, 1, 0 }
  0x19   : > { %s2667_s5 = scalar_select %p2214_p9, 1, 0 }
  0x1a   : > { %p186_p10 = scmp.eq.s32.totalorder %s1567_s24, 3  ;;  %s48_s7 = sor.u32 %s47_s28, %s46_s6 }
  0x1b   : > { %p51_p11 = scmp.eq.s32.totalorder %s48_s7, 0  ;;  %p1803_p13 = scmp.lt.s32.totalorder %s2108_s22, 4 }
  0x1c   : > { %p2220_p12 = por %p186_p10, %p66_p5  ;;  %s2649_s9 = sand.u32 1, %s2088_s17  }
  0x1d   : > { %s2227_s10 = scalar_select %p51_p11, %s2088_s17, %s53_s27  }
  0x1e   : > { %s2668_s8 = scalar_select %p2220_p12, 1, 0 }
  0x1f   : > { %2669 = sst [smem:[#allocation18_spill]] %s2227_s10  ;;  %s2231_s11 = sshll.u32 %s2649_s9, 5 }
  0x20   : > { %s1572_s12 = sshll.u32 %s2100_s20, 2  ;;  %s1573_s13 = sshll.u32 %s2104_s21, 3 }
  0x21   : > { %p2237_p0 = pnand %p1803_p13, %p2200_p3  ;;  %s227_s24 = sadd.s32 %s1573_s13, %s1572_s12 }
  0x22   : > { %s2241_s28 = sshll.u32 %s227_s24, 7  ;;  %s240_s6 = sand.u32 1, %s2108_s22  }
  0x23   : > { %s2671_s1 = sld [smem:[#allocation20_spill]]  ;;  %s244_s29 = scalar_lea.vmem [#allocation7], %s2231_s11 }
  0x24   : > { %s256_s9 = sshll.u32 %s244_s29, 4  ;;  %s2254_s25 = scalar_lea.sflag [#allocation8], %s240_s6  ;;  %s2251_s9 = int_to_ptr.vmem [resolvable:$true] %s256_s9 }
  0x25   : > { %p2260_p3 = pneg %p2237_p0 }
  0x29   : > { %s2248_s26 = scalar_lea.hbm %s2671_s1, %s2241_s28  ;;  %s1921_s27 = scalar_lea.hbm %s2671_s1, 2048 }
  0x2a   : > { %s1916_s12 = scalar_lea.hbm %s2248_s26, 512  ;;  %p1922_p6 = scmp.lt.u32.totalorder %s2248_s26, %s2671_s1 }
  0x2b   : > { %p1917_p2 = scmp.ne.s32.totalorder %s2248_s26, %s1916_s12  ;;  %p1923_p7 = scmp.lt.u32.totalorder %s1921_s27, %s1916_s12 }
  0x2c   : > { %p1925_p11 = scmp.lt.u32.totalorder %s1916_s12, %s2248_s26 }
  0x2d   : > { %p1919_p4 = pnand %p2260_p3, %p1917_p2  ;;  %p1924_p10 = por %p1923_p7, %p1922_p6 }
  0x2f   : > { %p1920_p5 = pneg %p1919_p4  ;;  %p1926_p13 = por %p1925_p11, %p1924_p10 }
  0x31   : > { %p1927_p1 = pnand %p1926_p13, %p1920_p5 }
  0x33   : > { %1930 = shalt.err (!%p1927_p1)
}
  0x34   : > { %s1931_s6 = scalar_lea.vmem %s2251_s9, 512  ;;  %s2110_s24 = smov [#allocation7]  }
  0x35   : > { %p1932_p2 = scmp.ne.s32.totalorder %s2251_s9, %s1931_s6  ;;  %s1936_s7 = sshll.u32 %s2110_s24, 4  ;;  %s1937_s7 = int_to_ptr.vmem [resolvable:$false] %s1936_s7 }
  0x36   : > { %s1938_s21 = scalar_lea.vmem %s1937_s7, 1024  ;;  %p1939_p9 = scmp.lt.s32.totalorder %s2251_s9, %s1937_s7 }
  0x37   : > { %p1934_p4 = pnand %p1932_p2, %p2260_p3  ;;  %p1940_p8 = scmp.lt.s32.totalorder %s1938_s21, %s1931_s6 }
  0x39   : > { %p1935_p12 = pneg %p1934_p4  ;;  %p1941_p6 = por %p1940_p8, %p1939_p9 }
  0x3b   : > { %p1942_p7 = pnand %p1941_p6, %p1935_p12 }
  0x3d   : > { %1945 = shalt.err (!%p1942_p7)
}
  0x3e   : > { %s2654_s12 = smov 128   ;;  %s2656_s27 = smov 8  }
  0x3f   : > { %1795 = dma.hbm_to_vmem [thread:$0]  (!%p2237_p0), %s2248_s26, 512, %s2251_s9, %s2254_s25, %s2654_s12, %s2654_s12, %s2656_s27  }
  0x40   : > { %p290_p8 = scmp.lt.s32.totalorder %s2108_s22, 5  ;;  %p2673_p9 = scmp.ge.s32.totalorder %s2108_s22, 1 }
  0x41   : > { %s2675_s0 = sld [smem:[#allocation19_spill]]  ;;  %s218_s21 = scalar_lea.vmem [#allocation4], %s2231_s11 }
  0x42   : > { %p2290_p12 = pnand %p2673_p9, %p290_p8  ;;  %s230_s1 = sshll.u32 %s218_s21, 4  ;;  %s2301_s1 = int_to_ptr.vmem [resolvable:$true] %s230_s1 }
  0x43   : > { %s2676_s26 = sand.u32 1, %s2088_s17  }
  0x44   : > { %s2674_s29 = scalar_select %p2290_p12, 1, 0 }
  0x45   : > { %s2305_s9 = scalar_lea.sflag [#allocation5], %s2676_s26 }
  0x47   : > { %s2298_s7 = scalar_lea.hbm %s2675_s0, %s2241_s28  ;;  %s1951_s24 = scalar_lea.hbm %s2675_s0, 2048 }
  0x48   : > { %s1946_s12 = scalar_lea.hbm %s2298_s7, 512  ;;  %p1952_p11 = scmp.lt.u32.totalorder %s2298_s7, %s2675_s0 }
  0x49   : > { %p1947_p1 = scmp.ne.s32.totalorder %s2298_s7, %s1946_s12  ;;  %p1953_p13 = scmp.lt.u32.totalorder %s1951_s24, %s1946_s12 }
  0x4a   : > { %p1955_p4 = scmp.lt.u32.totalorder %s1946_s12, %s2298_s7 }
  0x4b   : > { %p1949_p5 = pnand %p1947_p1, %p2260_p3  ;;  %p1954_p2 = por %p1953_p13, %p1952_p11 }
  0x4d   : > { %p1950_p10 = pneg %p1949_p5  ;;  %p1956_p6 = por %p1955_p4, %p1954_p2 }
  0x4f   : > { %p1957_p7 = pnand %p1956_p6, %p1950_p10 }
  0x51   : > { %1960 = shalt.err (!%p1957_p7)
}
  0x52   : > { %s1961_s21 = scalar_lea.vmem %s2301_s1, 512  ;;  %s2113_s27 = smov [#allocation4]  }
  0x53   : > { %p1962_p8 = scmp.ne.s32.totalorder %s2301_s1, %s1961_s21  ;;  %s1966_s26 = sshll.u32 %s2113_s27, 4  ;;  %s1967_s26 = int_to_ptr.vmem [resolvable:$false] %s1966_s26 }
  0x54   : > { %s1968_s20 = scalar_lea.vmem %s1967_s26, 1024  ;;  %p1969_p5 = scmp.lt.s32.totalorder %s2301_s1, %s1967_s26 }
  0x55   : > { %p1964_p9 = pnand %p1962_p8, %p2260_p3  ;;  %p1970_p12 = scmp.lt.s32.totalorder %s1968_s20, %s1961_s21 }
  0x57   : > { %p1965_p1 = pneg %p1964_p9  ;;  %p1971_p11 = por %p1970_p12, %p1969_p5 }
  0x59   : > { %p1972_p13 = pnand %p1971_p11, %p1965_p1 }
  0x5b   : > { %1975 = shalt.err (!%p1972_p13)
}
  0x5c   : > { %s2677_s10 = smov 8   ;;  %s2678_s12 = smov 128  }
  0x5d   : > { %1792 = dma.hbm_to_vmem [thread:$0]  (!%p2237_p0), %s2298_s7, 512, %s2301_s1, %s2305_s9, %s2678_s12, %s2678_s12, %s2677_s10  }
  0x5e   : > { %s2336_s27 = scalar_lea.hbm %s2645_s2, %s2241_s28  ;;  %s270_s21 = scalar_lea.vmem [#allocation9], %s2231_s11 }
  0x5f   : > { %s282_s26 = sshll.u32 %s270_s21, 4  ;;  %s1976_s20 = scalar_lea.hbm %s2336_s27, 512  ;;  %s2339_s26 = int_to_ptr.vmem [resolvable:$true] %s282_s26 }
  0x60   : > { %p1977_p12 = scmp.ne.s32.totalorder %s2336_s27, %s1976_s20  ;;  %s1981_s7 = scalar_lea.hbm %s2645_s2, 2048 }
  0x61   : > { %p1982_p4 = scmp.lt.u32.totalorder %s2336_s27, %s2645_s2  ;;  %p1983_p6 = scmp.lt.u32.totalorder %s1981_s7, %s1976_s20 }
  0x62   : > { %p1979_p10 = pnand %p1977_p12, %p2260_p3  ;;  %p1985_p8 = scmp.lt.u32.totalorder %s1976_s20, %s2336_s27 }
  0x63   : > { %p1984_p7 = por %p1983_p6, %p1982_p4 }
  0x64   : > { %p1980_p2 = pneg %p1979_p10 }
  0x65   : > { %p1986_p9 = por %p1985_p8, %p1984_p7 }
  0x67   : > { %p1987_p1 = pnand %p1986_p9, %p1980_p2 }
  0x69   : > { %1990 = shalt.err (!%p1987_p1)
}
  0x6a   : > { %s1991_s11 = scalar_lea.vmem %s2339_s26, 512  ;;  %s2114_s0 = smov [#allocation9]  }
  0x6b   : > { %p1992_p5 = scmp.ne.s32.totalorder %s2339_s26, %s1991_s11  ;;  %s1996_s6 = sshll.u32 %s2114_s0, 4  ;;  %s1997_s6 = int_to_ptr.vmem [resolvable:$false] %s1996_s6 }
  0x6c   : > { %s1998_s24 = scalar_lea.vmem %s1997_s6, 1024  ;;  %p1999_p12 = scmp.lt.s32.totalorder %s2339_s26, %s1997_s6 }
  0x6d   : > { %p1994_p11 = pnand %p1992_p5, %p2260_p3  ;;  %p2000_p10 = scmp.lt.s32.totalorder %s1998_s24, %s1991_s11 }
  0x6f   : > { %p1995_p13 = pneg %p1994_p11  ;;  %p2001_p4 = por %p2000_p10, %p1999_p12 }
  0x71   : > { %p2002_p6 = pnand %p2001_p4, %p1995_p13 }
  0x73   : > { %2005 = shalt.err (!%p2002_p6)
}
  0x74   : > { %1798 = dma.hbm_to_vmem [thread:$0]  (!%p2237_p0), %s2336_s27, 512, %s2339_s26, %s2254_s25, %s2678_s12, %s2678_s12, %s2677_s10  }
  0x75   : > { %p2679_p3 = scmp.ne.s32.totalorder %s2674_s29, 0 }
  0x76   : > { %s2369_s13 = sand.u32 (!%p2679_p3), 1, %s2084_s16   ;;  %p2680_p2 = scmp.ne.s32.totalorder (!%p2679_p3), %s2666_s30, 0 }
  0x77   : > { %294 = sbr.rel (%p2679_p3) target bundleno = 941 (0x3ad), region = 36  ;;  %s1584_s21 = sshll.u32 (!%p2679_p3), %s2369_s13, 5 }
  0x78   : > { %s297_s20 = scalar_lea.sflag (!%p2679_p3), [#allocation5], %s2369_s13  ;;  %s2373_s1 = scalar_lea.vmem (!%p2679_p3), [#allocation4], %s1584_s21 }
  0x7e   : > { %2067 = dma.done.wait (%p2680_p2), %s297_s20, 512  }
  0x7f   : > { %2069 = vsyncadd (%p2680_p2), %s297_s20, 4294966784  ;;  %s305_s25 = sand.u32 1, %s2186_s23   ;;  %s309_s29 = scalar_lea.vmem [#allocation7], %s1584_s21 }
  0x80   : > { %s306_s14 = scalar_lea.sflag [#allocation8], %s305_s25 }
  0x81   : > { %2071 = dma.done.wait (%p2680_p2), %s306_s14, 1024  }
  0x82   : > { %2073 = vsyncadd (%p2680_p2), %s306_s14, 4294966272  ;;  %s2384_s10 = scalar_lea.vmem [#allocation9], %s1584_s21  ;;  %s2386_s12 = scalar_lea.vmem [#allocation10], %s1584_s21 }
  0x83   : > { %p1588_p0 = scmp.ne.s32.totalorder %s2092_s18, 0 }
  0x84   : > { %vm370_vm0 = vcmask (!%p1588_p0), 261120   ;;  %vm379_vm1 = vcmask (!%p1588_p0), 253952   ;;  %v2115_v0 = vmov (!%p1588_p0), 0.0   ;;  %v2116_v1 = vmov (!%p1588_p0), 0.03125  }
  0x85   : > { %369 = sbr.rel (%p1588_p0) target bundleno = 140 (0x8c), region = 52  ;;  %371 = vst.msk [vmem:[#allocation2] sm:$0xff] (!%p1588_p0), %vm370_vm0, %v2115_v0  ;;  %372 = vst.msk [vmem:[#allocation2 + $0x8] sm:$0xff] (!%p1588_p0), %vm370_vm0, %v2115_v0 }
  0x86   : > { %373 = vst.msk [vmem:[#allocation2 + $0x10] sm:$0xff] (!%p1588_p0), %vm370_vm0, %v2115_v0  ;;  %374 = vst.msk [vmem:[#allocation2 + $0x18] sm:$0xff] (!%p1588_p0), %vm370_vm0, %v2115_v0 }
  0x87   : > { %375 = vst.msk [vmem:[#allocation2 + $0x20] sm:$0xff] (!%p1588_p0), %vm370_vm0, %v2115_v0  ;;  %376 = vst.msk [vmem:[#allocation2 + $0x28] sm:$0xff] (!%p1588_p0), %vm370_vm0, %v2115_v0 }
  0x88   : > { %377 = vst.msk [vmem:[#allocation2 + $0x30] sm:$0xff] (!%p1588_p0), %vm370_vm0, %v2115_v0  ;;  %378 = vst.msk [vmem:[#allocation2 + $0x38] sm:$0xff] (!%p1588_p0), %vm370_vm0, %v2115_v0 }
  0x89   : > { %380 = vst.msk [vmem:[#allocation3] sm:$0x1] (!%p1588_p0), %vm379_vm1, %v2116_v1  ;;  %381 = vst.msk [vmem:[#allocation3 + $0x1] sm:$0x1] (!%p1588_p0), %vm379_vm1, %v2116_v1 }
  0x8c PF: > { %v2389_v2 = vld [vmem:[%s309_s29] sm:$0xff]  ;;  %v2391_v3 = vld [vmem:[%s309_s29 + $0x8] sm:$0xff]  ;;  %vm460_vm2 = vcmask 261120   ;;  %v2393_v4 = vld [vmem:[%s309_s29 + $0x10] sm:$0xff]  ;;  %vm639_vm4 = vcmask 130048   ;;  %vm1338_vm9 = vcmask 253952  }
  0x8d   : > { %v1737_v5 = vpack.c.bf16 %v2391_v3, %v2389_v2  ;;  %vm1738_vm3 = vmpackc.low %vm460_vm2, %vm460_vm2  ;;  %v2399_v6 = vld [vmem:[%s309_s29 + $0x18] sm:$0xff]  ;;  %v2402_v7 = vld [vmem:[%s2373_s1] sm:$0xff]  ;;  %v426_v44 = vmin.f32 %v2389_v2, 0.0  ;;  %v427_v45 = vmin.f32 %v2391_v3, 0.0  ;;  %v428_v47 = vmin.f32 %v2393_v4, 0.0  ;;  %s1622_s7 = sshll.u32 %s2092_s18, 2 }
  0x8e   : > { %v1743_v8 = vpack.c.bf16 %v2399_v6, %v2393_v4  ;;  %1671 = vmatprep.mubr.msk.f32.mxu0 %vm460_vm2, %v2402_v7  ;;  %v2409_v9 = vld [vmem:[%s2373_s1 + $0x10] sm:$0xff]  ;;  %v2414_v10 = vld [vmem:[%s2373_s1 + $0x8] sm:$0xff]  ;;  %v2417_v11 = vld [vmem:[%s2373_s1 + $0x18] sm:$0xff]  ;;  %v429_v46 = vmin.f32 %v2399_v6, 0.0  ;;  %vm422_vm5 = vcmp.gt.f32.partialorder %v2389_v2, 0.0  ;;  %vm423_vm6 = vcmp.gt.f32.partialorder %v2391_v3, 0.0 }
  0x8f   : > { %1739 = vmatprep.subr.msk.bf16.mxu0 %vm1738_vm3, %v1737_v5  ;;  %1678 = vmatprep.mubr.msk.f32.mxu1 %vm460_vm2, %v2409_v9  ;;  %v430_v48 = vmul.f32 1.442695, %v426_v44  ;;  %v432_v49 = vmul.f32 1.442695, %v427_v45  ;;  %v434_v51 = vmul.f32 1.442695, %v428_v47 }
  0x90   : > { %1742 = vmatpush3.bf16.xpose.msk.msra.mxu0 %vm1738_vm3, %v1737_v5  ;;  %1745 = vmatprep.subr.msk.bf16.mxu1 %vm1738_vm3, %v1743_v8  ;;  %v436_v50 = vmul.f32 1.442695, %v429_v46  ;;  %v390_v52 = vld [vmem:[%s2384_s10] sm:$0xff]  ;;  %v391_v53 = vld [vmem:[%s2384_s10 + $0x8] sm:$0xff]  ;;  %v392_v55 = vld [vmem:[%s2384_s10 + $0x10] sm:$0xff]  ;;  %vm424_vm7 = vcmp.gt.f32.partialorder %v2393_v4, 0.0 }
  0x91   : > { %1748 = vmatpush3.bf16.xpose.msk.msra.mxu1 %vm1738_vm3, %v1743_v8  ;;  %v2449_v54 = vpack.c.bf16 %v391_v53, %v390_v52  ;;  %v393_v56 = vld [vmem:[%s2384_s10 + $0x18] sm:$0xff]  ;;  %v2459_v59 = vld [vmem:[#allocation2 + $0x8] sm:$0xff]  ;;  %vm425_vm8 = vcmp.gt.f32.partialorder %v2399_v6, 0.0  ;;  %vm394_vm10 = vcmp.gt.f32.partialorder %v2402_v7, 0.0  ;;  %vm395_vm11 = vcmp.gt.f32.partialorder %v2414_v10, 0.0  ;;  %s1623_s9 = sshll.u32 %s2096_s19, 3 }
  0x92   : > { %v2455_v57 = vld [vmem:[#allocation2] sm:$0xff]  ;;  %v2457_v58 = vpack.c.bf16 %v393_v56, %v392_v55  ;;  %v2470_v62 = vld [vmem:[#allocation2 + $0x28] sm:$0xff]  ;;  %v848_v55 = vlaneseq  ;;  %vm396_vm12 = vcmp.gt.f32.partialorder %v2409_v9, 0.0  ;;  %vm397_vm13 = vcmp.gt.f32.partialorder %v2417_v11, 0.0  ;;  %s1401_s28 = sadd.s32 %s1623_s9, %s1622_s7  ;;  %s1404_s19 = sshll.u32 %s2386_s12, 4  ;;  %s2569_s19 = int_to_ptr.vmem [resolvable:$true] %s1404_s19 }
  0x93   : > { %1750 = vmatprep.subr.bf16.mxu0 %v2449_v54  ;;  %v2463_v60 = vpack.c.bf16 %v2459_v59, %v2455_v57  ;;  %v2468_v61 = vld [vmem:[#allocation2 + $0x20] sm:$0xff]  ;;  %s1624_s18 = sshll.u32 %s1401_s28, 7  ;;  %s1386_s24 = scalar_lea.sflag [#allocation6], %s2369_s13 }
  0x94   : > { %1754 = vmatprep.subr.bf16.mxu1 %v2457_v58  ;;  %v2474_v0 = vpack.c.bf16 %v2470_v62, %v2468_v61  ;;  %v458_v45 = vld [vmem:[#allocation3] sm:$0x1]  ;;  %s2567_s6 = scalar_lea.hbm %s2647_s4, %s1624_s18  ;;  %s2006_s21 = scalar_lea.vmem %s2569_s19, 512 }
  0x95   : > { %p2007_p7 = scmp.ne.s32.totalorder %s2569_s19, %s2006_s21  ;;  %p2681_p8 = scmp.ne.s32.totalorder %s2667_s5, 0 }
  0x96   : > { %s2117_s20 = smov [#allocation10]  }
  0x97   : > { %1672 = vmatmul.mubr.msk.f32.vlgmr.msra.gmra.mrb[0].mxu0 %vm460_vm2, %v2414_v10  ;;  %p2008_p9 = pnand %p2007_p7, %p2681_p8  ;;  %s2010_s1 = sshll.u32 %s2117_s20, 4  ;;  %s2011_s1 = int_to_ptr.vmem [resolvable:$false] %s2010_s1 }
  0x98   : > { %1679 = vmatmul.mubr.msk.f32.vlgmr.msra.gmra.mrb[0].mxu1 %vm460_vm2, %v2417_v11  ;;  %1752 = vmatpush3.bf16.msra.mxu0 %v2449_v54  ;;  %s2012_s25 = scalar_lea.vmem %s2011_s1, 1024  ;;  %p2013_p5 = scmp.lt.s32.totalorder %s2569_s19, %s2011_s1 }
  0x99   : > { %1758 = vmatprep.subr.bf16.mxu0 %v2463_v60  ;;  %1756 = vmatpush3.bf16.msra.mxu1 %v2457_v58  ;;  %p2009_p1 = pneg %p2008_p9  ;;  %p2014_p11 = scmp.lt.s32.totalorder %s2012_s25, %s2006_s21 }
  0x9a   : > { %1766 = vmatprep.subr.bf16.mxu1 %v2474_v0 }
  0x9b   : > { %p2015_p13 = por %p2014_p11, %p2013_p5 }
  0x9d   : > { %p2016_p12 = pnand %p2015_p13, %p2009_p1 }
 0x16a   : > { %v1673_v12 = vpop.f32.mrb[0].mxu0 }
 0x16b   : > { %v636_v13 = vmul.f32 0.17677669, %v1673_v12  ;;  %v539_v14 = vpop.f32.mrb[1].mxu0  ;;  %v1680_v15 = vpop.f32.mrb[0].mxu1 }
 0x16c   : > { %v635_v16 = vmul.f32 0.17677669, %v539_v14  ;;  %v638_v17 = vmul.f32 0.17677669, %v1680_v15  ;;  %v626_v18 = vpop.f32.mrb[1].mxu1 }
 0x16d   : > { %v637_v19 = vmul.f32 0.17677669, %v626_v18  ;;  %v643_v20 = vsel %vm639_vm4, %v636_v13, -inf }
 0x16e   : > { %644 = vmax.xlane.f32.xlu1 %v643_v20  ;;  %v640_v21 = vsel %vm639_vm4, %v635_v16, -inf  ;;  %v649_v22 = vsel %vm639_vm4, %v638_v17, -inf }
 0x16f   : > { %641 = vmax.xlane.f32.xlu0 %v640_v21  ;;  %v646_v23 = vsel %vm639_vm4, %v637_v19, -inf }
 0x172   : > { %650 = vmax.xlane.f32.xlu1 %v649_v22 }
 0x173   : > { %647 = vmax.xlane.f32.xlu0 %v646_v23 }
 0x1fb   : > { %v645_v24 = vpop.xlane.xlu1 %644 }
 0x1fc   : > { %v653_v25 = vsub.f32 %v636_v13, %v645_v24  ;;  %v642_v26 = vpop.xlane.xlu0 %641 }
 0x1fd   : > { %v652_v27 = vsub.f32 %v635_v16, %v642_v26 }
 0x1fe   : > { %v658_v28 = vmul.f32 1.442695, %v653_v25 }
 0x1ff   : > { %v656_v29 = vmul.f32 1.442695, %v652_v27  ;;  %v651_v30 = vpop.xlane.xlu1 %650 }
 0x200   : > { %v655_v31 = vsub.f32 %v638_v17, %v651_v30  ;;  %v648_v32 = vpop.xlane.xlu0 %647 }
 0x201   : > { %1876 = vpow2.f32 %v656_v29  ;;  %v654_v33 = vsub.f32 %v637_v19, %v648_v32 }
 0x202   : > { %1878 = vpow2.f32 %v658_v28  ;;  %v662_v34 = vmul.f32 1.442695, %v655_v31 }
 0x203   : > { %v660_v35 = vmul.f32 1.442695, %v654_v33  ;;  %v398_v33 = vmin.f32 %v2402_v7, 0.0 }
 0x205   : > { %1880 = vpow2.f32 %v660_v35  ;;  %v399_v35 = vmin.f32 %v2414_v10, 0.0 }
 0x206   : > { %1882 = vpow2.f32 %v662_v34 }
 0x207   : > { %1884 = vpow2.f32 %v430_v48  ;;  %v404_v47 = vmul.f32 1.442695, %v399_v35 }
 0x208   : > { %1886 = vpow2.f32 %v432_v49  ;;  %v459_v49 = vld [vmem:[#allocation3 + $0x1] sm:$0x1] }
 0x209   : > { %1888 = vpow2.f32 %v436_v50 }
 0x20a   : > { %1890 = vpow2.f32 %v434_v51  ;;  %v401_v51 = vmin.f32 %v2417_v11, 0.0 }
 0x20b   : > { %v2427_v36 = vpop.eup %1876 }
 0x20c   : > { %v664_v37 = vsel %vm639_vm4, %v2427_v36, 0.0  ;;  %v2431_v38 = vpop.eup %1878  ;;  %v408_v53 = vmul.f32 1.442695, %v401_v51 }
 0x20d   : > { %665 = vadd.xlane.f32.xlu0 %v664_v37  ;;  %v667_v40 = vsel %vm639_vm4, %v2431_v38, 0.0 }
 0x20f   : > { %v2433_v39 = vpop.eup %1880 }
 0x210   : > { %v670_v41 = vsel %vm639_vm4, %v2433_v39, 0.0  ;;  %v2439_v42 = vpop.eup %1882 }
 0x211   : > { %668 = vadd.xlane.f32.xlu0 %v667_v40  ;;  %671 = vadd.xlane.f32.xlu1 %v670_v41  ;;  %v673_v43 = vsel %vm639_vm4, %v2439_v42, 0.0  ;;  %v1885_v63 = vpop.eup %1884  ;;  %v402_v40 = vmul.f32 1.442695, %v398_v33  ;;  %v400_v41 = vmin.f32 %v2409_v9, 0.0  ;;  %v2511_v33 = vld [vmem:[#allocation2 + $0x10] sm:$0xff] }
 0x212   : > { %v1887_v1 = vpop.eup %1886  ;;  %v1593_v12 = vadd.f32 -1.0, %v1885_v63  ;;  %v849_v63 = vshrl.u32 %v848_v55, 7  ;;  %v1341_v55 = vld [vmem:[%s2646_s3] sm:$0x1] }
 0x213   : > { %v1889_v5 = vpop.eup %1888  ;;  %v1594_v13 = vadd.f32 -1.0, %v1887_v1  ;;  %1892 = vpow2.f32 %v402_v40  ;;  %v406_v50 = vmul.f32 1.442695, %v400_v41 }
 0x214   : > { %v1891_v8 = vpop.eup %1890  ;;  %v1596_v15 = vadd.f32 -1.0, %v1889_v5  ;;  %v442_v16 = vsel %vm422_vm5, %v2389_v2, %v1593_v12  ;;  %1894 = vpow2.f32 %v404_v47  ;;  %v2494_v12 = vsub.s32 0, %v849_v63 }
 0x215   : > { %674 = vadd.xlane.f32.xlu1 %v673_v43  ;;  %v1595_v14 = vadd.f32 -1.0, %v1891_v8  ;;  %v443_v17 = vsel %vm423_vm6, %v2391_v3, %v1594_v13  ;;  %v446_v18 = vadd.f32 1.0, %v442_v16  ;;  %1896 = vpow2.f32 %v406_v50 }
 0x216   : > { %v445_v20 = vsel %vm425_vm8, %v2399_v6, %v1596_v15  ;;  %v447_v21 = vadd.f32 1.0, %v443_v17  ;;  %1898 = vpow2.f32 %v408_v53  ;;  %v851_v17 = vrot.slane %v458_v45, %v2494_v12 }
 0x217   : > { %v444_v19 = vsel %vm424_vm7, %v2393_v4, %v1595_v14  ;;  %v449_v23 = vadd.f32 1.0, %v445_v20  ;;  %v1318_v24 = vsel %vm460_vm2, %v446_v18, 0.0  ;;  %v1359_v63 = vsub.f32 1.0, %v1341_v55 }
 0x218   : > { %v448_v22 = vadd.f32 1.0, %v444_v19  ;;  %v1319_v25 = vsel %vm460_vm2, %v447_v21, 0.0 }
 0x219   : > { %v1328_v26 = vsel %vm460_vm2, %v449_v23, 0.0  ;;  %v1320_v27 = vadd.f32 %v1319_v25, %v1318_v24 }
 0x21a   : > { %v1327_v2 = vsel %vm460_vm2, %v448_v22, 0.0 }
 0x21b   : > { %v1329_v3 = vadd.f32 %v1328_v26, %v1327_v2  ;;  %v1321_v28 = vrot.slane %v1320_v27, 4 }
 0x21d   : > { %v1330_v29 = vrot.slane %v1329_v3, 4  ;;  %v1322_v4 = vadd.f32 %v1321_v28, %v1320_v27  ;;  %v1893_v56 = vpop.eup %1892 }
 0x21e   : > { %v1895_v1 = vpop.eup %1894  ;;  %v1589_v5 = vadd.f32 -1.0, %v1893_v56 }
 0x21f   : > { %v1331_v6 = vadd.f32 %v1330_v29, %v1329_v3  ;;  %v1323_v30 = vrot.slane %v1322_v4, 2  ;;  %v1897_v8 = vpop.eup %1896  ;;  %v1590_v14 = vadd.f32 -1.0, %v1895_v1 }
 0x220   : > { %v414_v13 = vsel %vm394_vm10, %v2402_v7, %v1589_v5  ;;  %v1591_v15 = vadd.f32 -1.0, %v1897_v8  ;;  %v1899_v16 = vpop.eup %1898  ;;  %v855_v7 = vrot.slane %v459_v49, %v2494_v12  ;;  %v1342_v5 = vld [vmem:[%s2646_s3 + $0x1] sm:$0x1] }
 0x221   : > { %v1332_v31 = vrot.slane %v1331_v6, 2  ;;  %v1324_v32 = vadd.f32 %v1323_v30, %v1322_v4  ;;  %v415_v19 = vsel %vm395_vm11, %v2414_v10, %v1590_v14  ;;  %v1360_v14 = vsub.f32 1.0, %v1342_v5 }
 0x222   : > { %v416_v20 = vsel %vm396_vm12, %v2409_v9, %v1591_v15 }
 0x223   : > { %v1333_v34 = vadd.f32 %v1332_v31, %v1331_v6  ;;  %v1325_v37 = vrot.slane %v1324_v32, 1  ;;  %v420_v24 = vadd.f32 1.0, %v416_v20 }
 0x225   : > { %v1334_v43 = vrot.slane %v1333_v34, 1  ;;  %v1326_v44 = vadd.f32 %v1325_v37, %v1324_v32  ;;  %v860_v27 = vmul.f32 %v855_v7, %v420_v24 }
 0x227   : > { %v1335_v46 = vadd.f32 %v1334_v43, %v1333_v34  ;;  %v1336_v48 = vadd.f32 %v1326_v44, %v458_v45  ;;  %v868_v9 = vsel %vm460_vm2, %v860_v27, 0.0  ;;  %v2513_v34 = vld [vmem:[#allocation2 + $0x18] sm:$0xff]  ;;  %v2519_v44 = vld [vmem:[#allocation2 + $0x30] sm:$0xff] }
 0x228   : > { %v1761_v43 = vpack.c.bf16 %v2513_v34, %v2511_v33  ;;  %v2521_v45 = vld [vmem:[#allocation2 + $0x38] sm:$0xff] }
 0x229   : > { %v1337_v52 = vadd.f32 %v1335_v46, %v459_v49  ;;  %1339 = vst.msk [vmem:[#allocation3] sm:$0x1] %vm1338_vm9, %v1336_v48 }
 0x22b   : > { %1340 = vst.msk [vmem:[#allocation3 + $0x1] sm:$0x1] %vm1338_vm9, %v1337_v52 }
 0x23e   : > { %1044 = vxpose.xlu0.b32.start [1/2] (short) (narrow) %v446_v18, 32  ;;  %v418_v18 = vadd.f32 1.0, %v414_v13 }
 0x242   : > { %1045 = vxpose.xlu0.b32.end [2/2] (short) (narrow) %v447_v21, 32  ;;  %v1592_v21 = vadd.f32 -1.0, %v1899_v16  ;;  %v1366_v16 = vrot.slane %v1359_v63, %v2494_v12 }
 0x244   : > { %v417_v25 = vsel %vm397_vm13, %v2417_v11, %v1592_v21 }
 0x245   : > { %v421_v3 = vadd.f32 1.0, %v417_v25 }
 0x247   : > { %v861_v28 = vmul.f32 %v855_v7, %v421_v3  ;;  %v1370_v7 = vrot.slane %v1360_v14, %v2494_v12 }
 0x248   : > { %1173 = vxpose.xlu1.b32.start [1/2] (short) (narrow) %v448_v22, 32  ;;  %v858_v22 = vmul.f32 %v851_v17, %v418_v18 }
 0x249   : > { %v871_v29 = vsel %vm460_vm2, %v861_v28, 0.0 }
 0x24a   : > { %v862_v26 = vsel %vm460_vm2, %v858_v22, 0.0 }
 0x24c   : > { %1174 = vxpose.xlu1.b32.end [2/2] (short) (narrow) %v449_v23, 32  ;;  %v419_v23 = vadd.f32 1.0, %v415_v19 }
 0x24e   : > { %v859_v2 = vmul.f32 %v851_v17, %v419_v23  ;;  %v1348_v17 = vrot.slane %v1341_v55, %v2494_v12 }
 0x250   : > { %v865_v10 = vsel %vm460_vm2, %v859_v2, 0.0 }
 0x277   : > { %863 = vadd.xlane.f32.xlu0 %v862_v26 }
 0x27b   : > { %866 = vadd.xlane.f32.xlu1 %v865_v10  ;;  %869 = vadd.xlane.f32.xlu0 %v868_v9 }
 0x27f   : > { %872 = vadd.xlane.f32.xlu1 %v871_v29 }
 0x29a   : > { %v666_v4 = vpop.xlane.xlu0 %665 }
 0x29b   : > { %1900 = vrcp.f32 %v666_v4 }
 0x29e   : > { %v672_v6 = vpop.xlane.xlu1 %671  ;;  %v669_v11 = vpop.xlane.xlu0 %668 }
 0x29f   : > { %1902 = vrcp.f32 %v672_v6 }
 0x2a0   : > { %1904 = vrcp.f32 %v669_v11 }
 0x2a2   : > { %v675_v30 = vpop.xlane.xlu1 %674 }
 0x2a3   : > { %1906 = vrcp.f32 %v675_v30 }
 0x2a5   : > { %v1901_v31 = vpop.eup %1900 }
 0x2a6   : > { %v680_v32 = vmul.f32 %v1901_v31, %v2427_v36 }
 0x2a8   : > { %1685 = vmatprep.mubr.msk.f32.mxu0 %vm639_vm4, %v680_v32 }
 0x2a9   : > { %v1903_v35 = vpop.eup %1902 }
 0x2aa   : > { %v1905_v37 = vpop.eup %1904  ;;  %v682_v40 = vmul.f32 %v1903_v35, %v2433_v39 }
 0x2ab   : > { %v681_v41 = vmul.f32 %v1905_v37, %v2431_v38  ;;  %v1769_v38 = vpack.c.bf16 %v2521_v45, %v2519_v44 }
 0x2ac   : > { %1692 = vmatprep.mubr.msk.f32.mxu1 %vm639_vm4, %v682_v40 }
 0x2ad   : > { %v1907_v36 = vpop.eup %1906  ;;  %1686 = vmatmul.mubr.msk.f32.vlgmr.msra.gmra.mrb[2].mxu0 %vm639_vm4, %v681_v41 }
 0x2ae   : > { %v683_v46 = vmul.f32 %v1907_v36, %v2439_v42  ;;  %1760 = vmatpush3.bf16.msra.mxu0 %v2463_v60  ;;  %1703 = vmatprep.mubr.msk.f32.mxu0 %vm460_vm2, %v418_v18 }
 0x2af   : > { %1762 = vmatprep.subr.bf16.mxu0 %v1761_v43 }
 0x2b0   : > { %1693 = vmatmul.mubr.msk.f32.vlgmr.msra.gmra.mrb[2].mxu1 %vm639_vm4, %v683_v46 }
 0x2b1   : > { %1768 = vmatpush3.bf16.msra.mxu1 %v2474_v0  ;;  %1714 = vmatprep.mubr.msk.f32.mxu1 %vm460_vm2, %v420_v24  ;;  %v1352_v24 = vrot.slane %v1342_v5, %v2494_v12 }
 0x2b2   : > { %1764 = vmatpush3.bf16.msra.mxu0 %v1761_v43  ;;  %1770 = vmatprep.subr.bf16.mxu1 %v1769_v38 }
 0x2b3   : > { %1774 = vmatprep.subr.bf16.mxu0 %v2449_v54 }
 0x2b5   : > { %1704 = vmatmul.mubr.msk.f32.vlgmr.msra.gmra.mrb[4].mxu0 %vm460_vm2, %v419_v23  ;;  %1772 = vmatpush3.bf16.msra.mxu1 %v1769_v38 }
 0x2b6   : > { %1776 = vmatpush3.bf16.msra.mxu0 %v2449_v54  ;;  %1778 = vmatprep.subr.bf16.mxu1 %v2457_v58 }
 0x2b8   : > { %1715 = vmatmul.mubr.msk.f32.vlgmr.msra.gmra.mrb[4].mxu1 %vm460_vm2, %v421_v3 }
 0x2b9   : > { %1780 = vmatpush3.bf16.msra.mxu1 %v2457_v58 }
 0x2be   : > { %v1060_v39 = vpop.trf.xlu0 }
 0x2bf   : > { %1721 = vmatprep.mubr.msk.f32.mxu0 %vm639_vm4, %v1060_v39 }
 0x2c2   : > { %v1061_v42 = vpop.trf.xlu0 }
 0x2c3   : > { %1722 = vmatmul.mubr.msk.f32.vlgmr.msra.gmra.mrb[6].mxu0 %vm639_vm4, %v1061_v42 }
 0x2c6   : > { %v1062_v60 = vpop.trf.xlu0 }
 0x2c7   : > { %1724 = vmatprep.mubr.msk.f32.mxu0 %vm639_vm4, %v1062_v60 }
 0x2c8   : > { %v1189_v0 = vpop.trf.xlu1 }
 0x2c9   : > { %1731 = vmatprep.mubr.msk.f32.mxu1 %vm639_vm4, %v1189_v0 }
 0x2ca   : > { %v1063_v47 = vpop.trf.xlu0 }
 0x2cb   : > { %1725 = vmatmul.mubr.msk.f32.gmra.mrb[8].mxu0 %vm639_vm4, %v1063_v47 }
 0x2cc   : > { %v1190_v54 = vpop.trf.xlu1 }
 0x2cd   : > { %1732 = vmatmul.mubr.msk.f32.vlgmr.msra.gmra.mrb[6].mxu1 %vm639_vm4, %v1190_v54 }
 0x2d0   : > { %v1191_v48 = vpop.trf.xlu1 }
 0x2d1   : > { %1734 = vmatprep.mubr.msk.f32.mxu1 %vm639_vm4, %v1191_v48 }
 0x2d4   : > { %v1192_v58 = vpop.trf.xlu1 }
 0x2d5   : > { %1735 = vmatmul.mubr.msk.f32.gmra.mrb[8].mxu1 %vm639_vm4, %v1192_v58 }
 0x304   : > { %v864_v50 = vpop.xlane.xlu0 %863 }
 0x308   : > { %v867_v49 = vpop.xlane.xlu1 %866  ;;  %v870_v52 = vpop.xlane.xlu0 %869 }
 0x309   : > { %1908 = vrcp.f32 %v867_v49 }
 0x30a   : > { %1910 = vrcp.f32 %v864_v50 }
 0x30c   : > { %v873_v51 = vpop.xlane.xlu1 %872 }
 0x30d   : > { %1912 = vrcp.f32 %v873_v51 }
 0x30e   : > { %1914 = vrcp.f32 %v870_v52 }
 0x313   : > { %v1909_v13 = vpop.eup %1908 }
 0x314   : > { %v1911_v15 = vpop.eup %1910 }
 0x317   : > { %v1913_v19 = vpop.eup %1912 }
 0x318   : > { %v1915_v22 = vpop.eup %1914 }
 0x380   : > { %v1687_v53 = vpop.f32.mrb[2].mxu0 }
 0x381   : > { %v756_v56 = vpop.f32.mrb[3].mxu0  ;;  %v1374_v25 = vmul.f32 %v1687_v53, %v1366_v16 }
 0x382   : > { %v1373_v27 = vmul.f32 %v1366_v16, %v756_v56 }
 0x383   : > { %v1694_v1 = vpop.f32.mrb[2].mxu1 }
 0x384   : > { %v837_v8 = vpop.f32.mrb[3].mxu1  ;;  %v1376_v4 = vmul.f32 %v1694_v1, %v1370_v7 }
 0x385   : > { %v1375_v11 = vmul.f32 %v1370_v7, %v837_v8 }
 0x388   : > { %v1705_v18 = vpop.f32.mrb[4].mxu0 }
 0x389   : > { %v1041_v20 = vmul.f32 %v1909_v13, %v1705_v18  ;;  %v946_v21 = vpop.f32.mrb[5].mxu0 }
 0x38a   : > { %v1040_v23 = vmul.f32 %v1911_v15, %v946_v21 }
 0x38b   : > { %v1356_v2 = vmul.f32 %v1348_v17, %v1041_v20  ;;  %v1716_v26 = vpop.f32.mrb[4].mxu1 }
 0x38c   : > { %v1355_v3 = vmul.f32 %v1348_v17, %v1040_v23  ;;  %v1043_v10 = vmul.f32 %v1913_v19, %v1716_v26  ;;  %v1027_v28 = vpop.f32.mrb[5].mxu1 }
 0x38d   : > { %v1378_v9 = vadd.f32 %v1374_v25, %v1356_v2  ;;  %v1042_v29 = vmul.f32 %v1915_v22, %v1027_v28 }
 0x38e   : > { %v1377_v12 = vadd.f32 %v1373_v27, %v1355_v3  ;;  %v1358_v6 = vmul.f32 %v1352_v24, %v1043_v10 }
 0x38f   : > { %1382 = vst.msk [vmem:[%s2386_s12 + $0x8] sm:$0xff] %vm460_vm2, %v1378_v9  ;;  %v1357_v30 = vmul.f32 %v1352_v24, %v1042_v29 }
 0x390   : > { %1381 = vst.msk [vmem:[%s2386_s12] sm:$0xff] %vm460_vm2, %v1377_v12  ;;  %v1380_v31 = vadd.f32 %v1376_v4, %v1358_v6 }
 0x391   : > { %v1379_v32 = vadd.f32 %v1375_v11, %v1357_v30 }
 0x392   : > { %1384 = vst.msk [vmem:[%s2386_s12 + $0x18] sm:$0xff] %vm460_vm2, %v1380_v31 }
 0x393   : > { %1383 = vst.msk [vmem:[%s2386_s12 + $0x10] sm:$0xff] %vm460_vm2, %v1379_v32 }
 0x394   : > { %2019 = shalt.err (!%p2016_p12)
}
 0x395   : > { %s2020_s14 = scalar_lea.hbm %s2567_s6, 512  ;;  %s2024_s12 = scalar_lea.hbm %s2647_s4, 2048 }
 0x396   : > { %p2021_p10 = scmp.ne.s32.totalorder %s2567_s6, %s2020_s14  ;;  %p2025_p3 = scmp.lt.u32.totalorder %s2567_s6, %s2647_s4 }
 0x397   : > { %p2026_p2 = scmp.lt.u32.totalorder %s2024_s12, %s2020_s14  ;;  %p2028_p7 = scmp.lt.u32.totalorder %s2020_s14, %s2567_s6 }
 0x398   : > { %p2022_p4 = pnand %p2021_p10, %p2681_p8 }
 0x399   : > { %p2027_p0 = por %p2026_p2, %p2025_p3 }
 0x39a   : > { %p2023_p6 = pneg %p2022_p4 }
 0x39b   : > { %p2029_p9 = por %p2028_p7, %p2027_p0 }
 0x39d   : > { %p2030_p1 = pnand %p2029_p9, %p2023_p6 }
 0x39f   : > { %2033 = shalt.err (!%p2030_p1)
}
 0x3a0   : > { %s2118_s27 = smov 128   ;;  %s2119_s26 = smov 8   ;;  %v1723_v35 = vpop.f32.mrb[6].mxu0  ;;  %v1733_v38 = vpop.f32.mrb[6].mxu1 }
 0x3a1   : > { %1787 = dma.vmem_to_hbm [thread:$0]  (%p2681_p8), %s2569_s19, 512, %s2567_s6, %s1386_s24, %s2118_s27, %s2118_s27, %s2119_s26   ;;  %v1303_v37 = vadd.f32 %v1723_v35, %v2459_v59  ;;  %v1154_v40 = vpop.f32.mrb[7].mxu0  ;;  %v1307_v42 = vadd.f32 %v1733_v38, %v2470_v62  ;;  %v1283_v60 = vpop.f32.mrb[7].mxu1 }
 0x3a2   : > { %v1302_v41 = vadd.f32 %v1154_v40, %v2455_v57  ;;  %v1726_v43 = vpop.f32.mrb[8].mxu0  ;;  %v1306_v59 = vadd.f32 %v1283_v60, %v2468_v61 }
 0x3a3   : > { %1311 = vst.msk [vmem:[#allocation2 + $0x8] sm:$0xff] %vm460_vm2, %v1303_v37  ;;  %v1305_v36 = vadd.f32 %v1726_v43, %v2513_v34  ;;  %v1164_v46 = vpop.f32.mrb[9].mxu0  ;;  %1315 = vst.msk [vmem:[#allocation2 + $0x28] sm:$0xff] %vm460_vm2, %v1307_v42 }
 0x3a4   : > { %1310 = vst.msk [vmem:[#allocation2] sm:$0xff] %vm460_vm2, %v1302_v41  ;;  %v1304_v39 = vadd.f32 %v1164_v46, %v2511_v33  ;;  %1314 = vst.msk [vmem:[#allocation2 + $0x20] sm:$0xff] %vm460_vm2, %v1306_v59 }
 0x3a5   : > { %1313 = vst.msk [vmem:[#allocation2 + $0x18] sm:$0xff] %vm460_vm2, %v1305_v36 }
 0x3a6   : > { %1312 = vst.msk [vmem:[#allocation2 + $0x10] sm:$0xff] %vm460_vm2, %v1304_v39 }
 0x3a8   : > { %v1736_v57 = vpop.f32.mrb[8].mxu1 }
 0x3a9   : > { %v1309_v34 = vadd.f32 %v1736_v57, %v2521_v45  ;;  %v1293_v0 = vpop.f32.mrb[9].mxu1 }
 0x3aa   : > { %v1308_v47 = vadd.f32 %v1293_v0, %v2519_v44 }
 0x3ab   : > { %1317 = vst.msk [vmem:[#allocation2 + $0x38] sm:$0xff] %vm460_vm2, %v1309_v34 }
 0x3ac   : > { %1316 = vst.msk [vmem:[#allocation2 + $0x30] sm:$0xff] %vm460_vm2, %v1308_v47 }
 0x3ad PF: > { %p1804_p8 = scmp.ge.s32.totalorder %s2108_s22, 2  ;;  %s1419_s5 = sand.u32 1, %s2080_s15  }
 0x3ae   : > { %p2682_p5 = scmp.ne.s32.totalorder %s2668_s8, 0  ;;  %s1420_s13 = scalar_lea.sflag [#allocation6], %s1419_s5 }
 0x3b0   : > { %p1800_p11 = pnand %p1804_p8, %p2682_p5 }
 0x3b2   : > { %2075 = dma.done.wait (!%p1800_p11), %s1420_s13, 512  }
 0x3b3   : > { %2077 = vsyncadd (!%p1800_p11), %s1420_s13, 4294966784  ;;  %s23_s22 = sadd.s32 1, %s2108_s22   ;;  %s2683_s7 = sld [smem:[#allocation18_spill]] }
 0x3b4   : > { %p20_p13 = scmp.ge.s32.totalorder %s23_s22, 6   ;;  %s2684_s18 = sld [smem:[#allocation14_spill]] }
 0x3b5   : > { %s2685_s19 = sld [smem:[#allocation15_spill]]  ;;  %s2686_s20 = sld [smem:[#allocation16_spill]] }
 0x3b6   : > { %s2687_s21 = sld [smem:[#allocation17_spill]]  ;;  %s2688_s15 = smov %s2084_s16 }
 0x3b7   : > { %s2689_s16 = smov %s2088_s17  ;;  %22 = sbr.rel (!%p20_p13) target bundleno = 12 (0xc), region = 112 }
 0x3b9   : > { %s2690_s17 = smov %s2683_s7 }
 0x3be   :  { %1425 = vsyncpa [#allocation5], 1 }
 0x3bf   :  { %1427 = vsyncpa [#allocation5 + $0x1], 1 }
 0x3c0   :  { %1428 = vsyncpa [#allocation8], 1 }
 0x3c1   :  { %1430 = vsyncpa [#allocation8 + $0x1], 1 }
 0x3c2   :  { %1431 = vsyncpa [#allocation6], 1 }
 0x3c3   :  { %1433 = vsyncpa [#allocation6 + $0x1], 1 }

</bundles_post_ra>
